<compile_context>
chip_gen: v5e
topology: v5e:2x2
jax: 0.10.0
libtpu: 0.0.40
codegen_flags: <defaults>
</compile_context>

<pallas_src>
import functools

import jax
import jax.numpy as jnp
from jax import lax
from jax.experimental import pallas as pl
from jax.experimental.pallas import tpu as pltpu

EPS = 1e-5  # PyTorch default eps for BatchNorm2d / InstanceNorm2d


def _round_up(x, m):
    return ((x + m - 1) // m) * m


def _bnin_kernel(x_ref, params_ref, o_ref, *, half, hw_real, ct):
    """One channel-tile of fused training-mode BN (global ch < half) + affine IN.

    x_ref:      (N, Ct, HWp)  activations (HW possibly zero-padded to mult of 128)
    params_ref: (Ct, 2)       col 0 = gamma, col 1 = beta (zero for padded channels)
    o_ref:      (N, Ct, HWp)  output
    """
    xf = x_ref[...].astype(jnp.float32)                   # (N, Ct, HWp)
    n = xf.shape[0]

    # ---- stats pass: per-(n, c) sum / sum-of-squares, keepdims (N, Ct, 1) layout
    # so C stays on sublanes and the later broadcast is a lane splat.
    s = jnp.sum(xf, axis=2, keepdims=True)                 # (N, Ct, 1)
    ss = jnp.sum(xf * xf, axis=2, keepdims=True)           # (N, Ct, 1)

    # Instance-norm stats: per (n, c) over the REAL HW (zero pad contributes 0).
    inv_hw = 1.0 / hw_real
    in_mean = s * inv_hw
    in_var = ss * inv_hw - in_mean * in_mean

    # Batch-norm stats: per c over (N, HW)  (tiny sublane reduction over N).
    inv_nhw = 1.0 / (n * hw_real)
    bn_mean = jnp.sum(s, axis=0, keepdims=True) * inv_nhw          # (1, Ct, 1)
    bn_var = jnp.sum(ss, axis=0, keepdims=True) * inv_nhw - bn_mean * bn_mean

    # Select BN vs IN stats using the GLOBAL channel index (grid is over C tiles).
    ch = pl.program_id(0) * ct + lax.broadcasted_iota(jnp.int32, in_mean.shape, 1)
    is_bn = ch < half
    mean = jnp.where(is_bn, bn_mean, in_mean)               # (N, Ct, 1)
    var = jnp.where(is_bn, bn_var, in_var)
    var = jnp.maximum(var, 0.0)  # guard E[x^2]-mean^2 cancellation before rsqrt

    # ---- fold affine into per-(n, c) scale / shift ----
    gamma = params_ref[:, 0:1][None]                        # (1, Ct, 1)
    beta = params_ref[:, 1:2][None]                         # (1, Ct, 1)
    scale = gamma * lax.rsqrt(var + EPS)                    # (N, Ct, 1)
    shift = beta - mean * scale                             # (N, Ct, 1)

    # ---- apply pass: y = x*scale + shift (re-read the VMEM block so the f32 copy
    # need not stay live across the stats pass for sub-f32 inputs).
    o_ref[...] = (x_ref[...].astype(jnp.float32) * scale + shift).astype(o_ref.dtype)


def bnin_forward(x, bn_gamma, bn_beta, in_gamma, in_beta, half, *, ct=8):
    """x: (N, C, H, W) NCHW.  Returns (N, C, H, W).

    ct: channel tile (multiple of 8).  At real CNN sizes sweep it so
    N*ct*HWp (x2 for double buffering, + f32 temporaries) fits ~32 MiB per core
    on v7x / ~64-96 MiB on v5e/v6e.
    """
    N, C, H, W = x.shape
    # torch.split(x, half, 1) yields exactly two chunks only when C <= 2*half.
    assert half < C <= 2 * half, "BNIN assumes a two-way channel split"
    assert ct % 8 == 0, "channel tile must be a multiple of 8 (sublane tiling)"

    HW = H * W
    HWp = _round_up(HW, 128)          # lane-dense output stores (unmasked vst)
    C_pad = _round_up(C, ct)

    x3 = x.reshape(N, C, HW)          # free reshape (trailing dims)
    if HWp != HW or C_pad != C:
        # Zero padding: sums are unaffected; we divide by the real HW in-kernel.
        x3 = jnp.pad(x3, ((0, 0), (0, C_pad - C), (0, HWp - HW)))

    pad_c = C_pad - C
    gamma = jnp.concatenate(
        [bn_gamma, in_gamma, jnp.zeros((pad_c,), jnp.float32)]).astype(jnp.float32)
    beta = jnp.concatenate(
        [bn_beta, in_beta, jnp.zeros((pad_c,), jnp.float32)]).astype(jnp.float32)
    params = jnp.stack([gamma, beta], axis=1)               # (C_pad, 2)

    grid = (C_pad // ct,)
    out = pl.pallas_call(
        functools.partial(_bnin_kernel, half=half, hw_real=HW, ct=ct),
        out_shape=jax.ShapeDtypeStruct((N, C_pad, HWp), x.dtype),
        grid=grid,
        in_specs=[
            pl.BlockSpec((N, ct, HWp), lambda c: (0, c, 0)),
            pl.BlockSpec((ct, 2), lambda c: (c, 0)),
        ],
        out_specs=pl.BlockSpec((N, ct, HWp), lambda c: (0, c, 0)),
        compiler_params=pltpu.CompilerParams(
            dimension_semantics=("parallel",),        # megacore sharding on v7x
            vmem_limit_bytes=48 * 1024 * 1024,        # above scoped default, < v7x 64MiB
        ),
    )(x3, params)

    return out[:, :C, :HW].reshape(N, C, H, W)


def _reference(x, bn_gamma, bn_beta, in_gamma, in_beta, half):
    """Pure-JAX reference replicating PyTorch training-mode BN + affine IN."""
    x = x.astype(jnp.float32)
    x1, x2 = x[:, :half], x[:, half:]

    m1 = jnp.mean(x1, axis=(0, 2, 3), keepdims=True)
    v1 = jnp.mean((x1 - m1) ** 2, axis=(0, 2, 3), keepdims=True)
    o1 = (x1 - m1) / jnp.sqrt(v1 + EPS)
    o1 = o1 * bn_gamma[None, :, None, None] + bn_beta[None, :, None, None]

    m2 = jnp.mean(x2, axis=(2, 3), keepdims=True)
    v2 = jnp.mean((x2 - m2) ** 2, axis=(2, 3), keepdims=True)
    o2 = (x2 - m2) / jnp.sqrt(v2 + EPS)
    o2 = o2 * in_gamma[None, :, None, None] + in_beta[None, :, None, None]

    return jnp.concatenate([o1, o2], axis=1)


if __name__ == "__main__":
    planes = 10
    half = int(planes * 0.6)          # 6 -> BN channels; remaining 4 -> IN channels
    N, H, W = 2, 16, 16

    key = jax.random.PRNGKey(0)
    kx, k1, k2, k3, k4 = jax.random.split(key, 5)

    x = jax.random.normal(kx, (N, planes, H, W), dtype=jnp.float32)

    # Deterministic, non-trivial affine params (PyTorch init would be ones/zeros;
    # perturbed so the affine path of the kernel is actually exercised).
    bn_gamma = 1.0 + 0.1 * jax.random.normal(k1, (half,), dtype=jnp.float32)
    bn_beta = 0.1 * jax.random.normal(k2, (half,), dtype=jnp.float32)
    in_gamma = 1.0 + 0.1 * jax.random.normal(k3, (planes - half,), dtype=jnp.float32)
    in_beta = 0.1 * jax.random.normal(k4, (planes - half,), dtype=jnp.float32)

    out = bnin_forward(x, bn_gamma, bn_beta, in_gamma, in_beta, half)
    out = jax.block_until_ready(out)

    ref = _reference(x, bn_gamma, bn_beta, in_gamma, in_beta, half)
    assert out.shape == (N, planes, H, W)
    assert jnp.max(jnp.abs(out - ref)) < 1e-4, "mismatch vs reference"

    print("KERNEL_OK")
</pallas_src>

<mosaic_0001>
module attributes {stable_mosaic.version = 11 : i64} {
  func.func @_bnin_kernel(%arg0: i32, %arg1: memref<2x8x256xf32, #tpu.memory_space<vmem>>, %arg2: memref<8x2xf32, #tpu.memory_space<vmem>>, %arg3: memref<2x8x256xf32, #tpu.memory_space<vmem>>) attributes {dimension_semantics = [#tpu.dimension_semantics<parallel>], iteration_bounds = array<i64: 2>, scalar_prefetch = 0 : i64, scratch_operands = 0 : i64, tpu.core_type = #tpu.core_type<tc>, window_params = [{transform_indices = @transform_0, window_bounds = array<i64: 2, 8, 256>}, {transform_indices = @transform_1, window_bounds = array<i64: 8, 2>}, {transform_indices = @transform_2, window_bounds = array<i64: 2, 8, 256>}]} {
    %c0 = arith.constant 0 : index
    %c0_0 = arith.constant 0 : index
    %c0_1 = arith.constant 0 : index
    %0 = vector.load %arg1[%c0, %c0_0, %c0_1] : memref<2x8x256xf32, #tpu.memory_space<vmem>>, vector<2x8x256xf32>
    %cst = arith.constant dense<0.000000e+00> : vector<2x8xf32>
    %1 = vector.multi_reduction <add>, %0, %cst [2] : vector<2x8x256xf32> to vector<2x8xf32>
    %2 = vector.shape_cast %1 : vector<2x8xf32> to vector<2x8x1xf32>
    %3 = arith.mulf %0, %0 : vector<2x8x256xf32>
    %cst_2 = arith.constant dense<0.000000e+00> : vector<2x8xf32>
    %4 = vector.multi_reduction <add>, %3, %cst_2 [2] : vector<2x8x256xf32> to vector<2x8xf32>
    %5 = vector.shape_cast %4 : vector<2x8xf32> to vector<2x8x1xf32>
    %cst_3 = arith.constant 3.906250e-03 : f32
    %6 = vector.broadcast %cst_3 : f32 to vector<2x8x1xf32>
    %7 = arith.mulf %2, %6 : vector<2x8x1xf32>
    %cst_4 = arith.constant 3.906250e-03 : f32
    %8 = vector.broadcast %cst_4 : f32 to vector<2x8x1xf32>
    %9 = arith.mulf %5, %8 : vector<2x8x1xf32>
    %10 = arith.mulf %7, %7 : vector<2x8x1xf32>
    %11 = arith.subf %9, %10 : vector<2x8x1xf32>
    %cst_5 = arith.constant dense<0.000000e+00> : vector<8x1xf32>
    %12 = vector.multi_reduction <add>, %2, %cst_5 [0] : vector<2x8x1xf32> to vector<8x1xf32>
    %13 = vector.shape_cast %12 : vector<8x1xf32> to vector<1x8x1xf32>
    %cst_6 = arith.constant 0.001953125 : f32
    %14 = vector.broadcast %cst_6 : f32 to vector<1x8x1xf32>
    %15 = arith.mulf %13, %14 : vector<1x8x1xf32>
    %cst_7 = arith.constant dense<0.000000e+00> : vector<8x1xf32>
    %16 = vector.multi_reduction <add>, %5, %cst_7 [0] : vector<2x8x1xf32> to vector<8x1xf32>
    %17 = vector.shape_cast %16 : vector<8x1xf32> to vector<1x8x1xf32>
    %cst_8 = arith.constant 0.001953125 : f32
    %18 = vector.broadcast %cst_8 : f32 to vector<1x8x1xf32>
    %19 = arith.mulf %17, %18 : vector<1x8x1xf32>
    %20 = arith.mulf %15, %15 : vector<1x8x1xf32>
    %21 = arith.subf %19, %20 : vector<1x8x1xf32>
    %c8_i32 = arith.constant 8 : i32
    %22 = arith.muli %arg0, %c8_i32 : i32
    %23 = tpu.iota {dimensions = array<i32: 1>} : vector<2x8x1xi32>
    %24 = vector.broadcast %22 : i32 to vector<2x8x1xi32>
    %25 = arith.addi %24, %23 : vector<2x8x1xi32>
    %c6_i32 = arith.constant 6 : i32
    %26 = vector.broadcast %c6_i32 : i32 to vector<2x8x1xi32>
    %27 = arith.cmpi slt, %25, %26 : vector<2x8x1xi32>
    %28 = vector.shape_cast %15 : vector<1x8x1xf32> to vector<1x8x1xf32>
    %29 = vector.broadcast %28 : vector<1x8x1xf32> to vector<2x8x1xf32>
    %30 = arith.select %27, %29, %7 : vector<2x8x1xi1>, vector<2x8x1xf32>
    %31 = vector.shape_cast %21 : vector<1x8x1xf32> to vector<1x8x1xf32>
    %32 = vector.broadcast %31 : vector<1x8x1xf32> to vector<2x8x1xf32>
    %33 = arith.select %27, %32, %11 : vector<2x8x1xi1>, vector<2x8x1xf32>
    %cst_9 = arith.constant 0.000000e+00 : f32
    %34 = vector.broadcast %cst_9 : f32 to vector<2x8x1xf32>
    %35 = arith.maximumf %33, %34 : vector<2x8x1xf32>
    %c0_10 = arith.constant 0 : index
    %c0_11 = arith.constant 0 : index
    %36 = vector.load %arg2[%c0_10, %c0_11] : memref<8x2xf32, #tpu.memory_space<vmem>>, vector<8x1xf32>
    %37 = vector.shape_cast %36 : vector<8x1xf32> to vector<1x8x1xf32>
    %c0_12 = arith.constant 0 : index
    %c1 = arith.constant 1 : index
    %38 = vector.load %arg2[%c0_12, %c1] : memref<8x2xf32, #tpu.memory_space<vmem>>, vector<8x1xf32>
    %39 = vector.shape_cast %38 : vector<8x1xf32> to vector<1x8x1xf32>
    %cst_13 = arith.constant 9.99999974E-6 : f32
    %40 = vector.broadcast %cst_13 : f32 to vector<2x8x1xf32>
    %41 = arith.addf %35, %40 : vector<2x8x1xf32>
    %42 = math.rsqrt %41 : vector<2x8x1xf32>
    %43 = vector.broadcast %37 : vector<1x8x1xf32> to vector<2x8x1xf32>
    %44 = arith.mulf %43, %42 : vector<2x8x1xf32>
    %45 = arith.mulf %30, %44 : vector<2x8x1xf32>
    %46 = vector.broadcast %39 : vector<1x8x1xf32> to vector<2x8x1xf32>
    %47 = arith.subf %46, %45 : vector<2x8x1xf32>
    %c0_14 = arith.constant 0 : index
    %c0_15 = arith.constant 0 : index
    %c0_16 = arith.constant 0 : index
    %48 = vector.load %arg1[%c0_14, %c0_15, %c0_16] : memref<2x8x256xf32, #tpu.memory_space<vmem>>, vector<2x8x256xf32>
    %49 = vector.broadcast %44 : vector<2x8x1xf32> to vector<2x8x256xf32>
    %50 = arith.mulf %48, %49 : vector<2x8x256xf32>
    %51 = vector.broadcast %47 : vector<2x8x1xf32> to vector<2x8x256xf32>
    %52 = arith.addf %50, %51 : vector<2x8x256xf32>
    %c0_17 = arith.constant 0 : index
    %c0_18 = arith.constant 0 : index
    %c0_19 = arith.constant 0 : index
    %53 = vector.load %arg3[%c0_17, %c0_18, %c0_19] : memref<2x8x256xf32, #tpu.memory_space<vmem>>, vector<2x8x256xf32>
    tpu.vector_store %arg3[%c0_17, %c0_18, %c0_19], %52 {strides = array<i32>} : memref<2x8x256xf32, #tpu.memory_space<vmem>>, vector<2x8x256xf32>,
    return
  }
  func.func @transform_0(%arg0: i32) -> (i32, i32, i32) {
    %c0_i32 = arith.constant 0 : i32
    %c0_i32_0 = arith.constant 0 : i32
    %c0_i32_1 = arith.constant 0 : i32
    return %c0_i32, %arg0, %c0_i32_0 : i32, i32, i32
  }
  func.func @transform_1(%arg0: i32) -> (i32, i32) {
    %c0_i32 = arith.constant 0 : i32
    %c0_i32_0 = arith.constant 0 : i32
    return %arg0, %c0_i32 : i32, i32
  }
  func.func @transform_2(%arg0: i32) -> (i32, i32, i32) {
    %c0_i32 = arith.constant 0 : i32
    %c0_i32_0 = arith.constant 0 : i32
    %c0_i32_1 = arith.constant 0 : i32
    return %c0_i32, %arg0, %c0_i32_0 : i32, i32, i32
  }
}

</mosaic_0001>

<bundles_post_ra>
// kernel: tpu_custom_call.1
= control target key start
LH: loop header
LB: loop body
LE: loop exit
PB: predicated region body
PF: predicated region fallthrough
CT: control target
= control target key end

     0   :  { %7 = vsyncpa [#allocation3], 0  ;;  %s763_s0 = inlined_call_operand.hbm [shape: f32[2,16,256], index: 0, kind: input, shape index: {}]   ;;  %s764_s1 = inlined_call_operand.vmem [shape: f32[16,2], index: 1, kind: input, shape index: {}]   ;;  %s765_s2 = inlined_call_operand.hbm [shape: f32[2,16,256], index: 2, kind: output, shape index: {}]  }
   0x1   :  { %9 = vsyncpa [#allocation3 + $0x1], 0 }
   0x2   :  { %10 = vsyncpa [#allocation4], 0 }
   0x3   :  { %12 = vsyncpa [#allocation4 + $0x1], 0  ;;  %s600_s9 = smov 0   ;;  %s602_s10 = smov 0  }
   0x4   :  { %s604_s11 = smov 0   ;;  %s606_s12 = smov 0  }
   0x5 LB: > { %s621_s13 = sadd.s32 4294967295, %s574_s12   ;;  %s397_s14 = sadd.s32 4294967294, %s574_s12   ;;  %s574_s12 = sphi %s606_s12, %s774_s12   ;;  %s570_s11 = sphi %s604_s11, %s773_s11   ;;  %s566_s10 = sphi %s602_s10, %s772_s10   ;;  %s562_s9 = sphi %s600_s9, %s771_s9  }
   0x6   : > { %s625_s15 = sadd.s32 1, %s574_s12   ;;  %s25_s16 = sadd.s32 1, %s570_s11 }
   0x7   : > { %s22_s17 = ssub.s32 %s574_s12, %s625_s15  ;;  %p32_p0 = scmp.ne.s32.totalorder %s570_s11, %s566_s10 }
   0x8   : > { %p23_p1 = scmp.eq.s32.totalorder %s22_s17, 0  ;;  %p33_p2 = scmp.eq.s32.totalorder %s574_s12, 0 }
   0x9   : > { %p38_p3 = scmp.ne.s32.totalorder %s566_s10, %s562_s9  ;;  %p39_p4 = scmp.eq.s32.totalorder %s621_s13, 0 }
   0xa   : > { %s637_s18 = scalar_select %p23_p1, %s570_s11, %s25_s16  }
   0xb   : > { %p639_p5 = por %p33_p2, %p32_p0  ;;  %p643_p6 = por %p39_p4, %p38_p3 }
   0xc   : > { %p88_p7 = scmp.eq.s32.totalorder %s621_s13, 1  ;;  %p94_p8 = scmp.eq.s32.totalorder %s397_s14, 1 }
   0xd   : > { %p399_p9 = scmp.ge.s32.totalorder %s574_s12, 2  ;;  %p427_p10 = scmp.lt.s32.totalorder %s574_s12, 2 }
   0xe   : > { %p650_p11 = por %p88_p7, %p32_p0  ;;  %p654_p12 = por %p94_p8, %p38_p3 }
   0xf   : > { %s114_s23 = sand.u32 1, %s570_s11   ;;  %s413_s24 = sshll.u32 %s574_s12, 4 }
  0x10   : > { %s400_s25 = sshll.u32 %s114_s23, 5  ;;  %s123_s28 = scalar_lea.hbm %s763_s0, %s413_s24 }
  0x11   : > { %s124_s29 = sshll.u32 %s123_s28, 4  ;;  %s118_s30 = scalar_lea.vmem [#allocation2], %s400_s25  ;;  %s125_s29 = int_to_ptr.hbm [resolvable:$true] %s124_s29 }
  0x12   : > { %s126_s3 = sshll.u32 %s118_s30, 4  ;;  %p665_p13 = pnand %p427_p10, %p639_p5  ;;  %s127_s3 = int_to_ptr.vmem [resolvable:$true] %s126_s3 }
  0x13   : > { %p403_p0 = scmp.ge.s32.totalorder %s574_s12, 1  ;;  %s115_s5 = scalar_lea.sflag [#allocation3], %s114_s23 }
  0x14   : > { %s478_s6 = sshra.s32 %s125_s29, 4  ;;  %p482_p2 = pneg %p665_p13  ;;  %s479_s6 = int_to_ptr.hbm [resolvable:$true] %s478_s6 }
  0x15   : > { %s480_s7 = scalar_lea.hbm %s479_s6, 32  ;;  %s485_s16 = scalar_lea.hbm %s763_s0, 64 }
  0x16   : > { %p481_p1 = scmp.ne.s32.totalorder %s479_s6, %s480_s7  ;;  %p486_p5 = scmp.lt.s32.totalorder %s479_s6, %s763_s0 }
  0x17   : > { %p487_p7 = scmp.lt.s32.totalorder %s485_s16, %s480_s7 }
  0x18   : > { %p483_p3 = pnand %p482_p2, %p481_p1 }
  0x19   : > { %p488_p8 = por %p487_p7, %p486_p5 }
  0x1a   : > { %p484_p4 = pneg %p483_p3 }
  0x1c   : > { %p489_p10 = pnand %p488_p8, %p484_p4 }
  0x1e   : > { %492 = shalt.err (!%p489_p10)
}
  0x1f   : > { %s576_s23 = smov 512   ;;  %s577_s24 = smov 256  }
  0x20   : > { %s578_s25 = smov 16   ;;  %p141_p1 = scmp.lt.s32.totalorder %s574_s12, 3 }
  0x21   : > { %422 = dma.hbm_to_vmem [thread:$0]  (!%p665_p13), %s125_s29, 512, %s127_s3, %s115_s5, %s576_s23, %s577_s24, %s578_s25  }
  0x22   : > { %p142_p2 = pnand %p403_p0, %p141_p1 }
  0x23   : > { %s684_s26 = sand.u32 (!%p142_p2), 1, %s566_s10  }
  0x24   : > { %145 = sbr.rel (%p142_p2) target bundleno = 404 (0x194), region = 28  ;;  %s404_s27 = sshll.u32 (!%p142_p2), %s684_s26, 5 }
  0x25   : > { %s148_s28 = scalar_lea.sflag (!%p142_p2), [#allocation3], %s684_s26  ;;  %s151_s30 = scalar_lea.vmem (!%p142_p2), [#allocation2], %s404_s27 }
  0x29   : > { %553 = dma.done.wait (%p643_p6), %s148_s28, 512  }
  0x2a   : > { %555 = vsyncadd (%p643_p6), %s148_s28, 4294966784  ;;  %v694_v0 = vld [vmem:[%s151_s30] sm:$0xff]  ;;  %v696_v1 = vld [vmem:[%s151_s30 + $0x8] sm:$0xff]  ;;  %v579_v12 = vmov 0   ;;  %v216_v15 = vlaneseq  ;;  %s407_s20 = sshll.u32 %s621_s13, 3  ;;  %p177_p6 = scmp.lt.s32.totalorder %s621_s13, 1 }
  0x2b   : > { %v185_v2 = vadd.f32 %v696_v1, %v694_v0  ;;  %v191_v3 = vmul.f32 %v694_v0, %v694_v0  ;;  %v192_v4 = vmul.f32 %v696_v1, %v696_v1  ;;  %v704_v5 = vld [vmem:[%s151_s30 + $0x10] sm:$0xff]  ;;  %v706_v6 = vld [vmem:[%s151_s30 + $0x18] sm:$0xff]  ;;  %471 = vset.pattern.permute.xlu1 %v579_v12  ;;  %470 = vset.pattern.permute.xlu0 %v579_v12  ;;  %v218_v21 = vstv %s407_s20  ;;  %s580_s7 = smov 1   ;;  %s414_s8 = sshll.u32 %s621_s13, 4 }
  0x2c   : > { %v193_v8 = vmul.f32 %v704_v5, %v704_v5  ;;  %v194_v9 = vmul.f32 %v706_v6, %v706_v6  ;;  %v188_v10 = vadd.f32 %v706_v6, %v704_v5  ;;  %v217_v18 = vshrl.u32 %v216_v15, 7  ;;  %s178_s29 = scalar_select %p177_p6, %s621_s13, 1 }
  0x2d   : > { %186 = vadd.xlane.f32.xlu0 %v185_v2  ;;  %v195_v7 = vadd.f32 %v192_v4, %v191_v3  ;;  %v581_v62 = vmov 1   ;;  %s176_s14 = scalar_lea.vmem [#allocation5], %s404_s27  ;;  %s308_s19 = scalar_lea.hbm %s765_s2, %s414_s8 }
  0x2e   : > { %v198_v11 = vadd.f32 %v194_v9, %v193_v8  ;;  %v219_v29 = vadd.s32 %v218_v21, %v217_v18  ;;  %s406_s3 = sshll.u32 %s178_s29, 3  ;;  %472 = vset.pattern.permute.xlu2 %v581_v62  ;;  %s309_s23 = sshll.u32 %s176_s14, 4  ;;  %s310_s23 = int_to_ptr.vmem [resolvable:$true] %s309_s23 }
  0x2f   : > { %196 = vadd.xlane.f32.xlu1 %v195_v7  ;;  %s180_s6 = scalar_lea.vmem %s764_s1, %s406_s3  ;;  %s311_s24 = sshll.u32 %s308_s19, 4  ;;  %s312_s24 = int_to_ptr.hbm [resolvable:$true] %s311_s24 }
  0x30   : > { %vm220_vm0 = vcmp.lt.s32.totalorder %v219_v29, 6  ;;  %v227_v51 = vld [vmem:[%s180_s6] sm:$0xff]  ;;  %s297_s13 = scalar_lea.sflag [#allocation4], %s684_s26  ;;  %s522_s25 = sshra.s32 %s312_s24, 4  ;;  %s523_s25 = int_to_ptr.hbm [resolvable:$true] %s522_s25 }
  0x31   : > { %s524_s27 = scalar_lea.hbm %s523_s25, 32  ;;  %s528_s20 = scalar_lea.hbm %s765_s2, 64 }
  0x32   : > { %p525_p13 = scmp.ne.s32.totalorder %s523_s25, %s524_s27  ;;  %p529_p4 = scmp.lt.s32.totalorder %s523_s25, %s765_s2 }
  0x33   : > { %p530_p5 = scmp.lt.s32.totalorder %s528_s20, %s524_s27 }
  0x34   : > { %p526_p0 = pnand %p525_p13, %p650_p11 }
  0x35   : > { %189 = vadd.xlane.f32.xlu0 %v188_v10  ;;  %p531_p7 = por %p530_p5, %p529_p4 }
  0x36   : > { %p527_p3 = pneg %p526_p0 }
  0x37   : > { %199 = vadd.xlane.f32.xlu1 %v198_v11 }
  0x38   : > { %p532_p8 = pnand %p531_p7, %p527_p3 }
  0xa0   : > { %v187_v13 = vpop.xlane.xlu0 %186 }
  0xa1   : > { %v201_v16 = vmul.f32 0.00390625, %v187_v13 }
  0xa2   : > { %v197_v14 = vpop.xlane.xlu1 %196 }
  0xa3   : > { %v205_v22 = vmul.f32 %v201_v16, %v201_v16  ;;  %v203_v23 = vmul.f32 0.00390625, %v197_v14 }
  0xa5   : > { %v207_v32 = vsub.f32 %v203_v23, %v205_v22 }
  0xa8   : > { %v190_v17 = vpop.xlane.xlu0 %189 }
  0xa9   : > { %v202_v19 = vmul.f32 0.00390625, %v190_v17  ;;  %v209_v20 = vadd.f32 %v190_v17, %v187_v13 }
  0xaa   : > { %v200_v24 = vpop.xlane.xlu1 %199 }
  0xab   : > { %v206_v25 = vmul.f32 %v202_v19, %v202_v19  ;;  %v210_v26 = vmul.f32 0.001953125, %v209_v20  ;;  %v204_v27 = vmul.f32 0.00390625, %v200_v24  ;;  %v211_v28 = vadd.f32 %v200_v24, %v197_v14 }
  0xad   : > { %v212_v30 = vmul.f32 0.001953125, %v211_v28  ;;  %v213_v31 = vmul.f32 %v210_v26, %v210_v26  ;;  %v208_v33 = vsub.f32 %v204_v27, %v206_v25  ;;  %v221_v58 = vsel %vm220_vm0, %v210_v26, %v201_v16 }
  0xae   : > { %v222_v60 = vsel %vm220_vm0, %v210_v26, %v202_v19 }
  0xaf   : > { %v214_v34 = vsub.f32 %v212_v30, %v213_v31 }
  0xb1   : > { %v223_v35 = vsel %vm220_vm0, %v214_v34, %v207_v32  ;;  %v224_v36 = vsel %vm220_vm0, %v214_v34, %v208_v33 }
  0xb2   : > { %v225_v37 = vmax.f32 %v223_v35, 0.0  ;;  %v226_v38 = vmax.f32 %v224_v36, 0.0 }
  0xb4   : > { %v228_v39 = vadd.f32 1e-05, %v225_v37  ;;  %v229_v40 = vadd.f32 1e-05, %v226_v38 }
  0xb6   : > { %474 = vrsqrt.f32 %v228_v39  ;;  %vm236_vm3 = vweird.f32 %v228_v39  ;;  %vm246_vm5 = vweird.f32 %v229_v40 }
  0xb7   : > { %476 = vrsqrt.f32 %v229_v40 }
  0xbc   : > { %v475_v41 = vpop.eup %474 }
  0xbd   : > { %v477_v42 = vpop.eup %476  ;;  %v231_v43 = vmul.f32 %v475_v41, %v228_v39  ;;  %vm237_vm1 = vweird.f32 %v475_v41 }
  0xbe   : > { %v241_v44 = vmul.f32 %v477_v42, %v229_v40  ;;  %vm247_vm2 = vweird.f32 %v477_v42  ;;  %vm238_vm4 = vmor %vm236_vm3, %vm237_vm1 }
  0xbf   : > { %v232_v45 = vmul.f32 %v475_v41, %v231_v43  ;;  %vm248_vm6 = vmor %vm246_vm5, %vm247_vm2 }
  0xc0   : > { %v242_v46 = vmul.f32 %v477_v42, %v241_v44 }
  0xc1   : > { %v233_v47 = vmul.f32 0.5, %v232_v45 }
  0xc2   : > { %v243_v48 = vmul.f32 0.5, %v242_v46 }
  0xc3   : > { %v234_v49 = vsub.f32 1.5, %v233_v47 }
  0xc4   : > { %v244_v50 = vsub.f32 1.5, %v243_v48 }
  0xc5   : > { %v235_v52 = vmul.f32 %v475_v41, %v234_v49 }
  0xc6   : > { %v245_v53 = vmul.f32 %v477_v42, %v244_v50 }
  0xc7   : > { %v239_v54 = vsel %vm238_vm4, %v475_v41, %v235_v52 }
  0xc8   : > { %v250_v55 = vmul.f32 %v239_v54, %v227_v51  ;;  %v249_v56 = vsel %vm248_vm6, %v477_v42, %v245_v53 }
  0xc9   : > { %v251_v57 = vmul.f32 %v249_v56, %v227_v51 }
  0xca   : > { %266 = vperm.xlu0 %470, %v250_v55   ;;  %v252_v59 = vmul.f32 %v250_v55, %v221_v58 }
  0xcb   : > { %271 = vperm.xlu1 %471, %v251_v57   ;;  %v253_v61 = vmul.f32 %v251_v57, %v222_v60 }
  0xcc   : > { %256 = vrot.lane.b32.xlu2 %v252_v59, %s580_s7 }
  0xd2   : > { %473 = vset.pattern.permute.xlu0 %v581_v62 }
  0xd4   : > { %258 = vrot.lane.b32.xlu2 %v253_v61, %s580_s7 }
 0x126   : > { %v257_v63 = vpop.permute.xlu2 %256 }
 0x127   : > { %v262_v2 = vsub.f32 %v227_v51, %v257_v63 }
 0x129   : > { %280 = vperm.xlu2 %472, %v262_v2  }
 0x12e   : > { %v259_v3 = vpop.permute.xlu2 %258 }
 0x12f   : > { %v263_v4 = vsub.f32 %v227_v51, %v259_v3 }
 0x131   : > { %285 = vperm.xlu2 %472, %v263_v4  }
 0x13c   : > { %v267_v7 = vpop.permute.xlu0 %266 }
 0x13d   : > { %v274_v8 = vmul.f32 %v267_v7, %v694_v0  ;;  %v275_v9 = vmul.f32 %v267_v7, %v696_v1  ;;  %v272_v13 = vpop.permute.xlu1 %271 }
 0x13e   : > { %v276_v0 = vmul.f32 %v272_v13, %v704_v5  ;;  %v277_v1 = vmul.f32 %v272_v13, %v706_v6 }
 0x183   : > { %v281_v10 = vpop.permute.xlu2 %280 }
 0x184   : > { %v288_v11 = vadd.f32 %v281_v10, %v274_v8  ;;  %v289_v12 = vadd.f32 %v281_v10, %v275_v9 }
 0x186   : > { %292 = vst [vmem:[%s176_s14] sm:$0xff] %v288_v11 }
 0x187   : > { %293 = vst [vmem:[%s176_s14 + $0x8] sm:$0xff] %v289_v12 }
 0x18b   : > { %v286_v14 = vpop.permute.xlu2 %285 }
 0x18c   : > { %v290_v15 = vadd.f32 %v286_v14, %v276_v0  ;;  %v291_v16 = vadd.f32 %v286_v14, %v277_v1 }
 0x18e   : > { %294 = vst [vmem:[%s176_s14 + $0x10] sm:$0xff] %v290_v15 }
 0x18f   : > { %295 = vst [vmem:[%s176_s14 + $0x18] sm:$0xff] %v291_v16 }
 0x190   : > { %535 = shalt.err (!%p532_p8)
}
 0x191   : > { %s582_s26 = smov 256   ;;  %s583_s4 = smov 512  }
 0x192   : > { %s584_s5 = smov 16  }
 0x193   : > { %417 = dma.vmem_to_hbm [thread:$0]  (%p650_p11), %s310_s23, 512, %s312_s24, %s297_s13, %s582_s26, %s583_s4, %s584_s5  }
 0x194 PF: > { %s326_s6 = sand.u32 1, %s562_s9   ;;  %p424_p10 = pnand %p399_p9, %p654_p12 }
 0x195   : > { %s327_s7 = scalar_lea.sflag [#allocation4], %s326_s6 }
 0x196   : > { %p425_p1 = pneg %p424_p10 }
 0x198   : > { %557 = dma.done.wait (%p425_p1), %s327_s7, 512  }
 0x199   : > { %559 = vsyncadd (%p425_p1), %s327_s7, 4294966784  ;;  %p15_p2 = scmp.ge.s32.totalorder %s625_s15, 4   ;;  %s771_s9 = smov %s566_s10 }
 0x19a   : > { %s772_s10 = smov %s570_s11  ;;  %s773_s11 = smov %s637_s18 }
 0x19b   : > { %s774_s12 = smov %s625_s15  ;;  %17 = sbr.rel (!%p15_p2) target bundleno = 5 (0x5), region = 76 }
 0x1a0   :  { %333 = vsyncpa [#allocation3], 1 }
 0x1a1   :  { %335 = vsyncpa [#allocation3 + $0x1], 1 }
 0x1a2   :  { %336 = vsyncpa [#allocation4], 1 }
 0x1a3   :  { %338 = vsyncpa [#allocation4 + $0x1], 1 }

</bundles_post_ra>
